<compile_context>
chip_gen: v6e
topology: v6e:2x2x1
jax: 0.10.0
libtpu: 0.0.40
codegen_flags: <defaults>
</compile_context>

<pallas_src>
import functools

import jax
import jax.numpy as jnp
from jax.experimental import pallas as pl
from jax.experimental.pallas import tpu as pltpu


def _label_smoothing_ce_kernel(preds_ref, target_ref, out_ref, *,
                               n_rows_total: int, n_classes: int,
                               per_row: bool):
    # preds_ref : (TILE_N, C)  input dtype (f32 or bf16), cast to f32 here
    # target_ref: (TILE_N, 1)  int32, values in [1, C]
    # out_ref   : per_row -> (TILE_N, 128) f32 : lane0 = -sum(logp), lane1 = nll
    #             else    -> (8, 128) f32      : row0/lane0, row0/lane1 = tile partial sums
    i = pl.program_id(0)
    tile_n = preds_ref.shape[0]

    x = preds_ref[...].astype(jnp.float32)                 # (TILE_N, C)
    t = target_ref[...].astype(jnp.int32) - 1              # (TILE_N, 1) zero-based

    # Row validity mask (handles a trailing partial tile: OOB rows are garbage).
    row_ids = i * tile_n + jax.lax.broadcasted_iota(jnp.int32, (tile_n, 1), 0)
    valid = row_ids < n_rows_total                         # (TILE_N, 1)

    # Stable logsumexp pieces (no materialized log_preds).
    m = jnp.max(x, axis=-1, keepdims=True)                 # (TILE_N, 1)
    sumexp = jnp.sum(jnp.exp(x - m), axis=-1, keepdims=True)
    lse = m + jnp.log(sumexp)                              # (TILE_N, 1)

    row_sum_x = jnp.sum(x, axis=-1, keepdims=True)         # (TILE_N, 1)

    # Gather x[row, target[row]] via a one-hot masked row-sum.
    cols = jax.lax.broadcasted_iota(jnp.int32, (tile_n, n_classes), 1)
    x_t = jnp.sum(jnp.where(cols == t, x, 0.0), axis=-1, keepdims=True)

    # -sum(log_preds) = C*lse - sum(x);   nll = lse - x[target]
    sum_neg = jnp.float32(n_classes) * lse - row_sum_x     # (TILE_N, 1)
    nll = lse - x_t                                        # (TILE_N, 1)

    sum_neg = jnp.where(valid, sum_neg, 0.0)
    nll = jnp.where(valid, nll, 0.0)

    if per_row:
        lane = jax.lax.broadcasted_iota(jnp.int32, (tile_n, 128), 1)
        out_ref[...] = jnp.where(lane == 0, sum_neg,
                                 jnp.where(lane == 1, nll, 0.0))
    else:
        s0 = jnp.sum(sum_neg)                              # tile partial: loss term
        s1 = jnp.sum(nll)                                  # tile partial: nll term
        row = jax.lax.broadcasted_iota(jnp.int32, (8, 128), 0)
        lane = jax.lax.broadcasted_iota(jnp.int32, (8, 128), 1)
        out_ref[...] = jnp.where((row == 0) & (lane == 0), s0,
                                 jnp.where((row == 0) & (lane == 1), s1, 0.0))


def _pick_tile_n(n: int, c: int, itemsize: int) -> int:
    # Keep each pipeline buffer ~<= 2 MiB so double-buffering + f32 temporaries
    # fit comfortably under the scoped-VMEM defaults on v5e/v6e/v7x.
    per_buf_budget = 2 * 1024 * 1024
    t = per_buf_budget // max(1, c * itemsize)
    t = max(16, min(512, t))
    t = (t // 16) * 16
    if t >= n:
        return n            # single block; full-array-dim escape for the (8,128) rule
    return t


def label_smoothing_cross_entropy(preds, target, epsilon: float = 0.0,
                                  reduction: str = "mean"):
    """Pallas TPU implementation of LabelSmoothingCrossEntropy.forward.

    preds : (N, C) float array (f32 or bf16 — streamed in native dtype)
    target: (N,)   int array with labels in [1, C] (module subtracts 1)
    Returns a scalar for reduction in {'mean','sum'}, a (N,) vector for 'none'.
    """
    n, c = preds.shape
    target2d = target.astype(jnp.int32).reshape(n, 1)

    tile_n = _pick_tile_n(n, c, preds.dtype.itemsize)
    num_tiles = -(-n // tile_n)
    per_row = (reduction == "none")

    kernel = functools.partial(_label_smoothing_ce_kernel,
                               n_rows_total=n, n_classes=c, per_row=per_row)

    in_specs = [
        pl.BlockSpec((tile_n, c), lambda i: (i, 0)),
        pl.BlockSpec((tile_n, 1), lambda i: (i, 0)),
    ]
    if per_row:
        out_shape = jax.ShapeDtypeStruct((num_tiles * tile_n, 128), jnp.float32)
        out_spec = pl.BlockSpec((tile_n, 128), lambda i: (i, 0))
    else:
        out_shape = jax.ShapeDtypeStruct((num_tiles * 8, 128), jnp.float32)
        out_spec = pl.BlockSpec((8, 128), lambda i: (i, 0))

    out = pl.pallas_call(
        kernel,
        grid=(num_tiles,),
        in_specs=in_specs,
        out_specs=out_spec,
        out_shape=out_shape,
        compiler_params=pltpu.CompilerParams(
            dimension_semantics=("parallel",),
            vmem_limit_bytes=32 * 1024 * 1024,
        ),
    )(preds, target2d)

    eps = jnp.float32(epsilon)
    if per_row:
        sum_neg = out[:n, 0]                 # per-sample -sum(log_preds)
        nll = out[:n, 1]                     # per-sample nll
        return eps * (sum_neg / c) + (1.0 - eps) * nll

    s_loss = jnp.sum(out[:, 0])              # sum of -sum(log_preds) over batch
    s_nll = jnp.sum(out[:, 1])               # sum of nll over batch
    if reduction == "mean":
        s_loss = s_loss / n
        s_nll = s_nll / n
    return eps * (s_loss / c) + (1.0 - eps) * s_nll


def _reference(preds, target, epsilon=0.0, reduction="mean"):
    # Pure-JAX reference mirroring the PyTorch module.
    c = preds.shape[-1]
    log_preds = jax.nn.log_softmax(preds.astype(jnp.float32), axis=-1)
    per_row = -jnp.sum(log_preds, axis=-1)
    nll_rows = -jnp.take_along_axis(
        log_preds, (target - 1).astype(jnp.int32)[:, None], axis=-1)[:, 0]
    if reduction == "mean":
        loss, nll = jnp.mean(per_row), jnp.mean(nll_rows)
    elif reduction == "sum":
        loss, nll = jnp.sum(per_row), jnp.sum(nll_rows)
    else:
        loss, nll = per_row, nll_rows
    return epsilon * (loss / c) + (1.0 - epsilon) * nll


if __name__ == "__main__":
    key = jax.random.PRNGKey(0)
    k1, k2 = jax.random.split(key)

    N, C = 8, 32                       # batch=8, num_classes=32
    preds = jax.random.normal(k1, (N, C), dtype=jnp.float32)
    # labels in [1, C] (the module does `target - 1`)
    target = jax.random.randint(k2, (N,), 1, C + 1, dtype=jnp.int32)
    epsilon = 0.1

    # f32 path: all three reductions, including 'none' (per-sample vector).
    for red in ("mean", "sum", "none"):
        out = jax.block_until_ready(
            label_smoothing_cross_entropy(preds, target,
                                          epsilon=epsilon, reduction=red))
        ref = _reference(preds, target, epsilon=epsilon, reduction=red)
        assert out.shape == ref.shape, (red, out.shape, ref.shape)
        assert jnp.allclose(out, ref, atol=1e-4, rtol=1e-4), (red, out, ref)

    # bf16 path: preds streamed from HBM as bf16, cast to f32 inside the kernel.
    preds_bf16 = preds.astype(jnp.bfloat16)
    out_bf = jax.block_until_ready(
        label_smoothing_cross_entropy(preds_bf16, target,
                                      epsilon=epsilon, reduction="mean"))
    ref_bf = _reference(preds_bf16.astype(jnp.float32), target,
                        epsilon=epsilon, reduction="mean")
    assert jnp.allclose(out_bf, ref_bf, atol=1e-3, rtol=1e-3), (out_bf, ref_bf)

    print("KERNEL_OK")
</pallas_src>

<mosaic_0001>
module attributes {stable_mosaic.version = 11 : i64} {
  func.func @_label_smoothing_ce_kernel(%arg0: i32, %arg1: memref<8x32xf32, #tpu.memory_space<vmem>>, %arg2: memref<8x1xi32, #tpu.memory_space<vmem>>, %arg3: memref<8x128xf32, #tpu.memory_space<vmem>>) attributes {dimension_semantics = [#tpu.dimension_semantics<parallel>], iteration_bounds = array<i64: 1>, scalar_prefetch = 0 : i64, scratch_operands = 0 : i64, tpu.core_type = #tpu.core_type<tc>, window_params = [{transform_indices = @transform_0, window_bounds = array<i64: 8, 32>}, {transform_indices = @transform_1, window_bounds = array<i64: 8, 1>}, {transform_indices = @transform_2, window_bounds = array<i64: 8, 128>}]} {
    %c0 = arith.constant 0 : index
    %c0_0 = arith.constant 0 : index
    %0 = vector.load %arg1[%c0, %c0_0] : memref<8x32xf32, #tpu.memory_space<vmem>>, vector<8x32xf32>
    %c0_1 = arith.constant 0 : index
    %c0_2 = arith.constant 0 : index
    %1 = vector.load %arg2[%c0_1, %c0_2] : memref<8x1xi32, #tpu.memory_space<vmem>>, vector<8x1xi32>
    %c1_i32 = arith.constant 1 : i32
    %2 = vector.broadcast %c1_i32 : i32 to vector<8x1xi32>
    %3 = arith.subi %1, %2 : vector<8x1xi32>
    %c8_i32 = arith.constant 8 : i32
    %4 = arith.muli %arg0, %c8_i32 : i32
    %5 = tpu.iota {dimensions = array<i32: 0>} : vector<8x1xi32>
    %6 = vector.broadcast %4 : i32 to vector<8x1xi32>
    %7 = arith.addi %6, %5 : vector<8x1xi32>
    %c8_i32_3 = arith.constant 8 : i32
    %8 = vector.broadcast %c8_i32_3 : i32 to vector<8x1xi32>
    %9 = arith.cmpi slt, %7, %8 : vector<8x1xi32>
    %cst = arith.constant dense<0xFF800000> : vector<8xf32>
    %10 = vector.multi_reduction <maximumf>, %0, %cst [1] : vector<8x32xf32> to vector<8xf32>
    %11 = vector.shape_cast %10 : vector<8xf32> to vector<8x1xf32>
    %12 = vector.broadcast %11 : vector<8x1xf32> to vector<8x32xf32>
    %13 = arith.subf %0, %12 : vector<8x32xf32>
    %14 = math.exp %13 : vector<8x32xf32>
    %cst_4 = arith.constant dense<0.000000e+00> : vector<8xf32>
    %15 = vector.multi_reduction <add>, %14, %cst_4 [1] : vector<8x32xf32> to vector<8xf32>
    %16 = vector.shape_cast %15 : vector<8xf32> to vector<8x1xf32>
    %17 = math.log %16 : vector<8x1xf32>
    %18 = arith.addf %11, %17 : vector<8x1xf32>
    %cst_5 = arith.constant dense<0.000000e+00> : vector<8xf32>
    %19 = vector.multi_reduction <add>, %0, %cst_5 [1] : vector<8x32xf32> to vector<8xf32>
    %20 = vector.shape_cast %19 : vector<8xf32> to vector<8x1xf32>
    %21 = tpu.iota {dimensions = array<i32: 1>} : vector<8x32xi32>
    %22 = vector.broadcast %3 : vector<8x1xi32> to vector<8x32xi32>
    %23 = arith.cmpi eq, %21, %22 : vector<8x32xi32>
    %cst_6 = arith.constant 0.000000e+00 : f32
    %24 = vector.broadcast %cst_6 : f32 to vector<8x32xf32>
    %25 = arith.select %23, %0, %24 : vector<8x32xi1>, vector<8x32xf32>
    %cst_7 = arith.constant dense<0.000000e+00> : vector<8xf32>
    %26 = vector.multi_reduction <add>, %25, %cst_7 [1] : vector<8x32xf32> to vector<8xf32>
    %27 = vector.shape_cast %26 : vector<8xf32> to vector<8x1xf32>
    %cst_8 = arith.constant 3.200000e+01 : f32
    %28 = vector.broadcast %cst_8 : f32 to vector<8x1xf32>
    %29 = arith.mulf %28, %18 : vector<8x1xf32>
    %30 = arith.subf %29, %20 : vector<8x1xf32>
    %31 = arith.subf %18, %27 : vector<8x1xf32>
    %cst_9 = arith.constant 0.000000e+00 : f32
    %32 = vector.broadcast %cst_9 : f32 to vector<8x1xf32>
    %33 = arith.select %9, %30, %32 : vector<8x1xi1>, vector<8x1xf32>
    %cst_10 = arith.constant 0.000000e+00 : f32
    %34 = vector.broadcast %cst_10 : f32 to vector<8x1xf32>
    %35 = arith.select %9, %31, %34 : vector<8x1xi1>, vector<8x1xf32>
    %36 = vector.shape_cast %33 : vector<8x1xf32> to vector<1x8x1xf32>
    %cst_11 = arith.constant dense<0.000000e+00> : vector<1xf32>
    %37 = vector.multi_reduction <add>, %36, %cst_11 [1, 2] : vector<1x8x1xf32> to vector<1xf32>
    %38 = vector.shape_cast %37 : vector<1xf32> to vector<1x1x1xf32>
    %39 = vector.extract %38[0, 0, 0] : f32 from vector<1x1x1xf32>
    %40 = vector.shape_cast %35 : vector<8x1xf32> to vector<1x8x1xf32>
    %cst_12 = arith.constant dense<0.000000e+00> : vector<1xf32>
    %41 = vector.multi_reduction <add>, %40, %cst_12 [1, 2] : vector<1x8x1xf32> to vector<1xf32>
    %42 = vector.shape_cast %41 : vector<1xf32> to vector<1x1x1xf32>
    %43 = vector.extract %42[0, 0, 0] : f32 from vector<1x1x1xf32>
    %44 = tpu.iota {dimensions = array<i32: 0>} : vector<8x128xi32>
    %45 = tpu.iota {dimensions = array<i32: 1>} : vector<8x128xi32>
    %c0_i32 = arith.constant 0 : i32
    %46 = vector.broadcast %c0_i32 : i32 to vector<8x128xi32>
    %47 = arith.cmpi eq, %44, %46 : vector<8x128xi32>
    %c0_i32_13 = arith.constant 0 : i32
    %48 = vector.broadcast %c0_i32_13 : i32 to vector<8x128xi32>
    %49 = arith.cmpi eq, %45, %48 : vector<8x128xi32>
    %50 = arith.andi %47, %49 : vector<8x128xi1>
    %c0_i32_14 = arith.constant 0 : i32
    %51 = vector.broadcast %c0_i32_14 : i32 to vector<8x128xi32>
    %52 = arith.cmpi eq, %44, %51 : vector<8x128xi32>
    %c1_i32_15 = arith.constant 1 : i32
    %53 = vector.broadcast %c1_i32_15 : i32 to vector<8x128xi32>
    %54 = arith.cmpi eq, %45, %53 : vector<8x128xi32>
    %55 = arith.andi %52, %54 : vector<8x128xi1>
    %cst_16 = arith.constant 0.000000e+00 : f32
    %56 = vector.broadcast %43 : f32 to vector<8x128xf32>
    %57 = vector.broadcast %cst_16 : f32 to vector<8x128xf32>
    %58 = arith.select %55, %56, %57 : vector<8x128xi1>, vector<8x128xf32>
    %59 = vector.broadcast %39 : f32 to vector<8x128xf32>
    %60 = arith.select %50, %59, %58 : vector<8x128xi1>, vector<8x128xf32>
    %c0_17 = arith.constant 0 : index
    %c0_18 = arith.constant 0 : index
    %61 = vector.load %arg3[%c0_17, %c0_18] : memref<8x128xf32, #tpu.memory_space<vmem>>, vector<8x128xf32>
    tpu.vector_store %arg3[%c0_17, %c0_18], %60 {strides = array<i32>} : memref<8x128xf32, #tpu.memory_space<vmem>>, vector<8x128xf32>,
    return
  }
  func.func @transform_0(%arg0: i32) -> (i32, i32) {
    %c0_i32 = arith.constant 0 : i32
    %c0_i32_0 = arith.constant 0 : i32
    return %arg0, %c0_i32 : i32, i32
  }
  func.func @transform_1(%arg0: i32) -> (i32, i32) {
    %c0_i32 = arith.constant 0 : i32
    %c0_i32_0 = arith.constant 0 : i32
    return %arg0, %c0_i32 : i32, i32
  }
  func.func @transform_2(%arg0: i32) -> (i32, i32) {
    %c0_i32 = arith.constant 0 : i32
    %c0_i32_0 = arith.constant 0 : i32
    return %arg0, %c0_i32 : i32, i32
  }
}

</mosaic_0001>

<bundles_post_ra>
// kernel: tpu_custom_call.1
= control target key start
LH: loop header
LB: loop body
LE: loop exit
PB: predicated region body
PF: predicated region fallthrough
CT: control target
= control target key end

     0   :  { %vm21_vm0 = vcmask 261120   ;;  %s161_s0 = inlined_call_operand.vmem [shape: f32[8,32], index: 0, kind: input, shape index: {}]   ;;  %s162_s1 = inlined_call_operand.vmem [shape: s32[8,1], index: 1, kind: input, shape index: {}]   ;;  %s163_s2 = inlined_call_operand.hbm [shape: f32[8,128], index: 2, kind: output, shape index: {}]  }
   0x1   :  { %v12_v0 = vld [vmem:[%s161_s0] sm:$0xff] }
   0x2   :  { %7 = vsyncpa [#allocation3], 0  ;;  %v22_v1 = vsel %vm21_vm0, %v12_v0, -inf  ;;  %v131_v2 = vmov 0   ;;  %v13_v3 = vld [vmem:[%s162_s1] sm:$0xff]  ;;  %v16_v8 = vlaneseq  ;;  %v34_v13 = vsel %vm21_vm0, %v12_v0, 0.0 }
   0x3   :  { %104 = vset.pattern.permute.xlu0 %v131_v2  ;;  %v97_v4 = vadd.s32 4294967295, %v13_v3  ;;  %vm52_vm2 = vcmask 7168   ;;  %s132_s1 = smov [#allocation2]  }
   0x4   :  { %23 = vmax.xlane.f32.xlu0 %v22_v1  ;;  %v38_v9 = vand.u32 127, %v16_v8  ;;  %v17_v41 = vshrl.u32 %v16_v8, 7  ;;  %s89_s13 = sshll.u32 %s132_s1, 4  ;;  %s90_s13 = int_to_ptr.vmem [resolvable:$true] %s89_s13 }
   0x5   :  { %s109_s15 = scalar_lea.vmem %s90_s13, 128  ;;  %p114_p1 = scmp.lt.s32.totalorder %s90_s13, %s90_s13 }
   0x6   :  { %vm73_vm3 = vcmp.eq.s32.totalorder %v17_v41, 0  ;;  %vm76_vm4 = vcmp.eq.s32.totalorder %v38_v9, 1  ;;  %vm74_vm5 = vcmp.eq.s32.totalorder %v38_v9, 0  ;;  %p110_p0 = scmp.ne.s32.totalorder %s90_s13, %s109_s15  ;;  %p115_p2 = scmp.lt.s32.totalorder %s109_s15, %s109_s15 }
   0x7   :  { %vm77_vm6 = vmand %vm73_vm3, %vm76_vm4 }
   0x8   :  { %vm75_vm7 = vmand %vm73_vm3, %vm74_vm5  ;;  %p116_p3 = por %p115_p2, %p114_p1 }
   0xa   :  { %p117_p4 = pnand %p116_p3, %p110_p0 }
  0x1a   :  { %40 = vperm.xlu0 %104, %v97_v4  }
  0x8d   :  { %v24_v5 = vpop.xlane.xlu0 %23 }
  0x8e   :  { %v25_v6 = vsub.f32 %v12_v0, %v24_v5 }
  0x90   :  { %v26_v7 = vmul.f32 1.442695, %v25_v6 }
  0x92   :  { %105 = vpow2.f32 %v26_v7 }
  0x95   :  { %v41_v10 = vpop.permute.xlu0 %40 }
  0x96   :  { %vm42_vm1 = vcmp.eq.s32.totalorder %v38_v9, %v41_v10 }
  0x97   :  { %v43_v14 = vsel %vm42_vm1, %v12_v0, 0.0 }
  0x98   :  { %v44_v15 = vsel %vm21_vm0, %v43_v14, 0.0 }
  0x9f   :  { %v106_v11 = vpop.eup %105 }
  0xa0   :  { %v28_v12 = vsel %vm21_vm0, %v106_v11, 0.0 }
  0xa1   :  { %29 = vadd.xlane.f32.xlu1 %v28_v12 }
  0xa5   :  { %35 = vadd.xlane.f32.xlu1 %v34_v13 }
  0xa9   :  { %45 = vadd.xlane.f32.xlu1 %v44_v15 }
 0x12a   :  { %v30_v16 = vpop.xlane.xlu1 %29 }
 0x12b   :  { %107 = vlog2.f32 %v30_v16 }
 0x12e   :  { %v36_v18 = vpop.xlane.xlu1 %35 }
 0x132   :  { %v46_v22 = vpop.xlane.xlu1 %45 }
 0x138   :  { %v108_v17 = vpop.eup %107 }
 0x139   :  { %v32_v19 = vmul.f32 0.6931472, %v108_v17 }
 0x13b   :  { %v33_v20 = vadd.f32 %v32_v19, %v24_v5 }
 0x13d   :  { %v47_v21 = vmul.f32 32.0, %v33_v20  ;;  %v49_v24 = vsub.f32 %v33_v20, %v46_v22 }
 0x13f   :  { %v48_v23 = vsub.f32 %v47_v21, %v36_v18  ;;  %v63_v26 = vsel %vm52_vm2, %v49_v24, 0.0 }
 0x141   :  { %v53_v25 = vsel %vm52_vm2, %v48_v23, 0.0 }
 0x142   :  { %54 = vadd.xlane.f32.xlu1 %v53_v25 }
 0x146   :  { %64 = vadd.xlane.f32.xlu1 %v63_v26 }
 0x1cb   :  { %v55_v27 = vpop.xlane.xlu1 %54 }
 0x1cc   :  { %v56_v28 = vrot.slane %v55_v27, 4 }
 0x1ce   :  { %v57_v29 = vadd.f32 %v56_v28, %v55_v27 }
 0x1cf   :  { %v65_v30 = vpop.xlane.xlu1 %64 }
 0x1d0   :  { %v58_v31 = vrot.slane %v57_v29, 2  ;;  %v66_v32 = vrot.slane %v65_v30, 4 }
 0x1d2   :  { %v67_v33 = vadd.f32 %v66_v32, %v65_v30  ;;  %v59_v34 = vadd.f32 %v58_v31, %v57_v29 }
 0x1d4   :  { %v68_v35 = vrot.slane %v67_v33, 2  ;;  %v60_v36 = vrot.slane %v59_v34, 1 }
 0x1d6   :  { %v69_v37 = vadd.f32 %v68_v35, %v67_v33  ;;  %v61_v38 = vadd.f32 %v60_v36, %v59_v34 }
 0x1d8   :  { %98 = vpush %v61_v38  ;;  %v70_v39 = vrot.slane %v69_v37, 1 }
 0x1da   :  { %v71_v40 = vadd.f32 %v70_v39, %v69_v37 }
 0x1dc   :  { %100 = vpush %v71_v40 }
 0x209   :  { %s99_s0 = spop %98 }
 0x20a   :  { %v80_v43 = vstv %s99_s0 }
 0x20d   :  { %s101_s14 = spop %100 }
 0x20e   :  { %v78_v42 = vstv %s101_s14 }
 0x20f   :  { %v79_v44 = vsel %vm77_vm6, %v78_v42, 0.0 }
 0x210   :  { %v81_v45 = vsel %vm75_vm7, %v80_v43, %v79_v44 }
 0x211   :  { %82 = vst [vmem:[#allocation2] sm:$0xff] %v81_v45 }
 0x212   :  { %120 = shalt.err (!%p117_p4)
}
 0x213   :  { %92 = dma.vmem_to_hbm [thread:$0]  %s90_s13, 128, %s163_s2, [#allocation3]  }
 0x214   :  { %129 = dma.done.wait [#allocation3], 128  }
 0x215   :  { %130 = vsyncadd [#allocation3], 4294967168 }
 0x216   :  { %96 = vsyncpa [#allocation3], 1 }

</bundles_post_ra>
